<compile_context>
chip_gen: v6e
topology: v6e:2x2x1
jax: 0.10.0
libtpu: 0.0.40
codegen_flags: <defaults>
</compile_context>

<pallas_src>
import numpy as np
import jax
import jax.numpy as jnp
from jax.experimental import pallas as pl
from jax.experimental.pallas import tpu as pltpu

LANE = 128   # last dim padded to a multiple of 128 -> lane-dense, unmasked stores
ROW = 16     # rows padded to a multiple of 16 -> aligned prefix slices (f32 AND bf16)


def _round_up(n, m):
    return ((n + m - 1) // m) * m


def _pad2d(a, rows, cols, dtype):
    a = jnp.asarray(a)
    r, c = a.shape
    return jnp.pad(a, ((0, rows - r), (0, cols - c))).astype(dtype)


# ----------------------------- fused Pallas kernel -------------------------- #

def _build_fused_kernel(num_layers, n_dst_pad, is_final, negative_slope=0.01):
    """Kernel arg order: x, proj_w, proj_b, [A_i, wl_i, bl_i, wr_i]*L, (fc_w, fc_b), o."""

    def kernel(*refs):
        it = iter(refs)
        x_ref, pw_ref, pb_ref = next(it), next(it), next(it)

        # initial_proj: bf16 MXU operands, f32 accumulation + f32 epilogue.
        x = jnp.dot(x_ref[...], pw_ref[...],
                    preferred_element_type=jnp.float32) + pb_ref[...]

        # SAGEConv (aggr='mean'): agg = A @ x_src ; out = agg@wl + bl + x_tgt@wr
        for i in range(num_layers):
            a_ref, wl_ref, bl_ref, wr_ref = next(it), next(it), next(it), next(it)
            xb = x.astype(jnp.bfloat16)               # single cast feeds both matmuls
            agg = jnp.dot(a_ref[...], xb, preferred_element_type=jnp.float32)
            h = jnp.dot(agg.astype(jnp.bfloat16), wl_ref[...],
                        preferred_element_type=jnp.float32) + bl_ref[...]
            # x_tgt is an aligned (multiple-of-16 rows) prefix of the resident
            # activation -> free view, no relayout and no extra DMA.
            h = h + jnp.dot(xb[:n_dst_pad[i]], wr_ref[...],
                            preferred_element_type=jnp.float32)
            if i != num_layers - 1:
                h = jnp.where(h > 0, h, negative_slope * h)   # leaky_relu, f32 VPU
                # dropout(p=0.5, training=False) -> identity in eval mode
                # TODO(synk): training-mode dropout via pltpu.prng_seed/prng_random_bits.
            x = h

        if is_final:
            fcw_ref, fcb_ref = next(it), next(it)
            x = jnp.dot(x.astype(jnp.bfloat16), fcw_ref[...],
                        preferred_element_type=jnp.float32) + fcb_ref[...]

        o_ref = next(it)
        o_ref[...] = x.astype(o_ref.dtype)            # lane-dense (rows_pad, 128k) store

    return kernel


# ------------------------------- glue (host/JAX) ----------------------------- #

def mean_adjacency(edge_index, n_src, n_dst, n_src_pad, n_dst_pad):
    """Dense scatter-mean matrix, built host-side (no per-call XLA scatter-add).

    A[t, s] = (#edges s->t) / max(in_degree(t), 1).  Padded rows/cols are zero so
    padded (garbage) activation rows never leak into the aggregation.
    """
    src = np.asarray(edge_index[0])
    dst = np.asarray(edge_index[1])
    a = np.zeros((n_dst_pad, n_src_pad), np.float32)
    np.add.at(a, (dst, src), 1.0)
    deg = a.sum(axis=1, keepdims=True)
    a = a / np.maximum(deg, 1.0)
    return jnp.asarray(a).astype(jnp.bfloat16)


def gnn_forward(x, adjs, params, is_final=True):
    """Fused forward: one pallas_call, padded/lane-dense, activations kept on-chip."""
    num_layers = len(params["convs"])

    n_rows, f_in = x.shape
    rows_pad = _round_up(n_rows, ROW)
    f_pad = _round_up(f_in, LANE)

    inputs = [
        _pad2d(x, rows_pad, f_pad, jnp.bfloat16),
        _pad2d(params["proj_w"], f_pad, f_pad, jnp.bfloat16),
        _pad2d(params["proj_b"], 1, f_pad, jnp.float32),
    ]
    flops = 2 * rows_pad * f_pad * f_pad

    cur_rows_real, cur_rows_pad = n_rows, rows_pad
    cur_f_real, cur_f_pad = f_in, f_pad

    n_dst_pad_list = []
    for i, (edge_index, _eid, size) in enumerate(adjs):
        n_src, n_dst = size
        assert n_src == cur_rows_real, "NeighborSampler hop size mismatch"
        n_dst_pad = _round_up(n_dst, ROW)
        a = mean_adjacency(edge_index, n_src, n_dst, cur_rows_pad, n_dst_pad)
        conv = params["convs"][i]
        f_out = conv["wl"].shape[1]
        f_out_pad = _round_up(f_out, LANE)
        inputs += [
            a,
            _pad2d(conv["wl"], cur_f_pad, f_out_pad, jnp.bfloat16),
            _pad2d(conv["bl"], 1, f_out_pad, jnp.float32),
            _pad2d(conv["wr"], cur_f_pad, f_out_pad, jnp.bfloat16),
        ]
        n_dst_pad_list.append(n_dst_pad)
        flops += 2 * (n_dst_pad * cur_rows_pad * cur_f_pad
                      + 2 * n_dst_pad * cur_f_pad * f_out_pad)
        cur_rows_real, cur_rows_pad = n_dst, n_dst_pad
        cur_f_real, cur_f_pad = f_out, f_out_pad

    if is_final:
        f_out = params["fc_w"].shape[1]
        f_out_pad = _round_up(f_out, LANE)
        inputs += [
            _pad2d(params["fc_w"], cur_f_pad, f_out_pad, jnp.bfloat16),
            _pad2d(params["fc_b"], 1, f_out_pad, jnp.float32),
        ]
        flops += 2 * cur_rows_pad * cur_f_pad * f_out_pad
        cur_f_real, cur_f_pad = f_out, f_out_pad

    out_shape = jax.ShapeDtypeStruct((cur_rows_pad, cur_f_pad), jnp.float32)
    in_bytes = sum(int(a.size) * a.dtype.itemsize for a in inputs)
    out_bytes = cur_rows_pad * cur_f_pad * 4
    # Explicit scoped-VMEM budget from the actual padded sizes (double-buffer + compiler
    # scratch headroom), clamped to stay well under v7x's 64 MiB physical VMEM.
    vmem_limit = int(min(96 << 20, max(16 << 20, 2 * (in_bytes + out_bytes) + (4 << 20))))

    kernel = _build_fused_kernel(num_layers, tuple(n_dst_pad_list), is_final)
    vmem_spec = pl.BlockSpec(memory_space=pltpu.MemorySpace.VMEM)
    out_pad = pl.pallas_call(
        kernel,
        out_shape=out_shape,
        in_specs=[vmem_spec] * len(inputs),
        out_specs=vmem_spec,
        compiler_params=pltpu.CompilerParams(vmem_limit_bytes=vmem_limit),
        cost_estimate=pl.CostEstimate(
            flops=int(flops), transcendentals=0,
            bytes_accessed=int(in_bytes + out_bytes)),
    )(*inputs)

    # Trim row/lane padding back to the module's true output shape.
    return out_pad[:cur_rows_real, :cur_f_real]


def ref_forward(x, adjs, params, is_final=True):
    """Pure-JAX f32 reference matching the PyTorch GNN (eval mode)."""
    x = x @ params["proj_w"] + params["proj_b"]
    num_layers = len(params["convs"])
    for i, (edge_index, _eid, size) in enumerate(adjs):
        n_src, n_dst = size
        xt = x[:n_dst]
        src = np.asarray(edge_index[0]); dst = np.asarray(edge_index[1])
        a = np.zeros((n_dst, n_src), np.float32)
        np.add.at(a, (dst, src), 1.0)
        a = a / np.maximum(a.sum(axis=1, keepdims=True), 1.0)
        c = params["convs"][i]
        out = (jnp.asarray(a) @ x) @ c["wl"] + c["bl"] + xt @ c["wr"]
        if i != num_layers - 1:
            out = jnp.where(out > 0, out, 0.01 * out)
        x = out
    if is_final:
        x = x @ params["fc_w"] + params["fc_b"]
    return x


# --------------------------------- driver ----------------------------------- #

if __name__ == "__main__":
    key = jax.random.PRNGKey(0)
    ks = jax.random.split(key, 16)

    input_size, hidden_size, output_size = 16, 32, 3
    N0, N1, N2 = 24, 12, 4          # node counts per sampling hop
    E0, E1 = 48, 24                 # edge counts per hop

    def init_w(k, shape, scale=0.1):
        return (scale * jax.random.normal(k, shape)).astype(jnp.float32)

    params = {
        # initial_proj: Linear(input_size, input_size)
        "proj_w": init_w(ks[0], (input_size, input_size)),
        "proj_b": init_w(ks[1], (1, input_size)),
        "convs": [
            {   # SAGEConv(input_size, hidden_size): lin_l (with bias), lin_r (no bias)
                "wl": init_w(ks[2], (input_size, hidden_size)),
                "bl": init_w(ks[3], (1, hidden_size)),
                "wr": init_w(ks[4], (input_size, hidden_size)),
            },
            {   # SAGEConv(hidden_size, hidden_size)
                "wl": init_w(ks[5], (hidden_size, hidden_size)),
                "bl": init_w(ks[6], (1, hidden_size)),
                "wr": init_w(ks[7], (hidden_size, hidden_size)),
            },
        ],
        # fc: Linear(hidden_size, output_size)
        "fc_w": init_w(ks[8], (hidden_size, output_size)),
        "fc_b": init_w(ks[9], (1, output_size)),
    }

    # Node features and sampled bipartite adjacencies (NeighborSampler-style).
    x = jax.random.normal(ks[10], (N0, input_size), jnp.float32)
    ei0 = jnp.stack([jax.random.randint(ks[11], (E0,), 0, N0),
                     jax.random.randint(ks[12], (E0,), 0, N1)]).astype(jnp.int32)
    ei1 = jnp.stack([jax.random.randint(ks[13], (E1,), 0, N1),
                     jax.random.randint(ks[14], (E1,), 0, N2)]).astype(jnp.int32)
    adjs = [(ei0, None, (N0, N1)), (ei1, None, (N1, N2))]

    out = gnn_forward(x, adjs, params, is_final=True)
    out = jax.block_until_ready(out)

    ref = ref_forward(x, adjs, params, is_final=True)
    assert out.shape == (N2, output_size), out.shape
    # Tolerance loosened vs the pure-f32 path: MXU operands are bf16 (f32 accumulation).
    assert jnp.allclose(out, ref, rtol=3e-2, atol=3e-2), "mismatch vs reference"

    print("KERNEL_OK")
</pallas_src>

<mosaic_0001>
module attributes {stable_mosaic.version = 11 : i64} {
  func.func @kernel(%arg0: memref<32x128xbf16, #tpu.memory_space<vmem>>, %arg1: memref<128x128xbf16, #tpu.memory_space<vmem>>, %arg2: memref<1x128xf32, #tpu.memory_space<vmem>>, %arg3: memref<16x32xbf16, #tpu.memory_space<vmem>>, %arg4: memref<128x128xbf16, #tpu.memory_space<vmem>>, %arg5: memref<1x128xf32, #tpu.memory_space<vmem>>, %arg6: memref<128x128xbf16, #tpu.memory_space<vmem>>, %arg7: memref<16x16xbf16, #tpu.memory_space<vmem>>, %arg8: memref<128x128xbf16, #tpu.memory_space<vmem>>, %arg9: memref<1x128xf32, #tpu.memory_space<vmem>>, %arg10: memref<128x128xbf16, #tpu.memory_space<vmem>>, %arg11: memref<128x128xbf16, #tpu.memory_space<vmem>>, %arg12: memref<1x128xf32, #tpu.memory_space<vmem>>, %arg13: memref<16x128xf32, #tpu.memory_space<vmem>>) attributes {dimension_semantics = [], scalar_prefetch = 0 : i64, scratch_operands = 0 : i64, tpu.core_type = #tpu.core_type<tc>} {
    %c0 = arith.constant 0 : index
    %c0_0 = arith.constant 0 : index
    %0 = vector.load %arg0[%c0, %c0_0] : memref<32x128xbf16, #tpu.memory_space<vmem>>, vector<32x128xbf16>
    %c0_1 = arith.constant 0 : index
    %c0_2 = arith.constant 0 : index
    %1 = vector.load %arg1[%c0_1, %c0_2] : memref<128x128xbf16, #tpu.memory_space<vmem>>, vector<128x128xbf16>
    %cst = arith.constant dense<0.000000e+00> : vector<32x128xf32>
    %2 = tpu.matmul %0, %1, %cst {dimension_numbers = #tpu.dot_dimension_numbers<[1], [0], [0], [1], [0, 0, 1, 1], [], []>} : vector<32x128xbf16>, vector<128x128xbf16>, vector<32x128xf32> -> vector<32x128xf32>
    %c0_3 = arith.constant 0 : index
    %c0_4 = arith.constant 0 : index
    %3 = vector.load %arg2[%c0_3, %c0_4] : memref<1x128xf32, #tpu.memory_space<vmem>>, vector<1x128xf32>
    %4 = vector.broadcast %3 : vector<1x128xf32> to vector<32x128xf32>
    %5 = arith.addf %2, %4 : vector<32x128xf32>
    %6 = arith.truncf %5 : vector<32x128xf32> to vector<32x128xbf16>
    %c0_5 = arith.constant 0 : index
    %c0_6 = arith.constant 0 : index
    %7 = vector.load %arg3[%c0_5, %c0_6] : memref<16x32xbf16, #tpu.memory_space<vmem>>, vector<16x32xbf16>
    %cst_7 = arith.constant dense<0.000000e+00> : vector<16x128xf32>
    %8 = tpu.matmul %7, %6, %cst_7 {dimension_numbers = #tpu.dot_dimension_numbers<[1], [0], [0], [1], [0, 0, 1, 1], [], []>} : vector<16x32xbf16>, vector<32x128xbf16>, vector<16x128xf32> -> vector<16x128xf32>
    %9 = arith.truncf %8 : vector<16x128xf32> to vector<16x128xbf16>
    %c0_8 = arith.constant 0 : index
    %c0_9 = arith.constant 0 : index
    %10 = vector.load %arg4[%c0_8, %c0_9] : memref<128x128xbf16, #tpu.memory_space<vmem>>, vector<128x128xbf16>
    %cst_10 = arith.constant dense<0.000000e+00> : vector<16x128xf32>
    %11 = tpu.matmul %9, %10, %cst_10 {dimension_numbers = #tpu.dot_dimension_numbers<[1], [0], [0], [1], [0, 0, 1, 1], [], []>} : vector<16x128xbf16>, vector<128x128xbf16>, vector<16x128xf32> -> vector<16x128xf32>
    %c0_11 = arith.constant 0 : index
    %c0_12 = arith.constant 0 : index
    %12 = vector.load %arg5[%c0_11, %c0_12] : memref<1x128xf32, #tpu.memory_space<vmem>>, vector<1x128xf32>
    %13 = vector.broadcast %12 : vector<1x128xf32> to vector<16x128xf32>
    %14 = arith.addf %11, %13 : vector<16x128xf32>
    %15 = vector.extract_strided_slice %6 {offsets = [0, 0], sizes = [16, 128], strides = [1, 1]} : vector<32x128xbf16> to vector<16x128xbf16>
    %c0_13 = arith.constant 0 : index
    %c0_14 = arith.constant 0 : index
    %16 = vector.load %arg6[%c0_13, %c0_14] : memref<128x128xbf16, #tpu.memory_space<vmem>>, vector<128x128xbf16>
    %cst_15 = arith.constant dense<0.000000e+00> : vector<16x128xf32>
    %17 = tpu.matmul %15, %16, %cst_15 {dimension_numbers = #tpu.dot_dimension_numbers<[1], [0], [0], [1], [0, 0, 1, 1], [], []>} : vector<16x128xbf16>, vector<128x128xbf16>, vector<16x128xf32> -> vector<16x128xf32>
    %18 = arith.addf %14, %17 : vector<16x128xf32>
    %cst_16 = arith.constant 0.000000e+00 : f32
    %19 = vector.broadcast %cst_16 : f32 to vector<16x128xf32>
    %20 = arith.cmpf ogt, %18, %19 : vector<16x128xf32>
    %cst_17 = arith.constant 0.00999999977 : f32
    %21 = vector.broadcast %cst_17 : f32 to vector<16x128xf32>
    %22 = arith.mulf %21, %18 : vector<16x128xf32>
    %23 = arith.select %20, %18, %22 : vector<16x128xi1>, vector<16x128xf32>
    %24 = arith.truncf %23 : vector<16x128xf32> to vector<16x128xbf16>
    %c0_18 = arith.constant 0 : index
    %c0_19 = arith.constant 0 : index
    %25 = vector.load %arg7[%c0_18, %c0_19] : memref<16x16xbf16, #tpu.memory_space<vmem>>, vector<16x16xbf16>
    %cst_20 = arith.constant dense<0.000000e+00> : vector<16x128xf32>
    %26 = tpu.matmul %25, %24, %cst_20 {dimension_numbers = #tpu.dot_dimension_numbers<[1], [0], [0], [1], [0, 0, 1, 1], [], []>} : vector<16x16xbf16>, vector<16x128xbf16>, vector<16x128xf32> -> vector<16x128xf32>
    %27 = arith.truncf %26 : vector<16x128xf32> to vector<16x128xbf16>
    %c0_21 = arith.constant 0 : index
    %c0_22 = arith.constant 0 : index
    %28 = vector.load %arg8[%c0_21, %c0_22] : memref<128x128xbf16, #tpu.memory_space<vmem>>, vector<128x128xbf16>
    %cst_23 = arith.constant dense<0.000000e+00> : vector<16x128xf32>
    %29 = tpu.matmul %27, %28, %cst_23 {dimension_numbers = #tpu.dot_dimension_numbers<[1], [0], [0], [1], [0, 0, 1, 1], [], []>} : vector<16x128xbf16>, vector<128x128xbf16>, vector<16x128xf32> -> vector<16x128xf32>
    %c0_24 = arith.constant 0 : index
    %c0_25 = arith.constant 0 : index
    %30 = vector.load %arg9[%c0_24, %c0_25] : memref<1x128xf32, #tpu.memory_space<vmem>>, vector<1x128xf32>
    %31 = vector.broadcast %30 : vector<1x128xf32> to vector<16x128xf32>
    %32 = arith.addf %29, %31 : vector<16x128xf32>
    %c0_26 = arith.constant 0 : index
    %c0_27 = arith.constant 0 : index
    %33 = vector.load %arg10[%c0_26, %c0_27] : memref<128x128xbf16, #tpu.memory_space<vmem>>, vector<128x128xbf16>
    %cst_28 = arith.constant dense<0.000000e+00> : vector<16x128xf32>
    %34 = tpu.matmul %24, %33, %cst_28 {dimension_numbers = #tpu.dot_dimension_numbers<[1], [0], [0], [1], [0, 0, 1, 1], [], []>} : vector<16x128xbf16>, vector<128x128xbf16>, vector<16x128xf32> -> vector<16x128xf32>
    %35 = arith.addf %32, %34 : vector<16x128xf32>
    %36 = arith.truncf %35 : vector<16x128xf32> to vector<16x128xbf16>
    %c0_29 = arith.constant 0 : index
    %c0_30 = arith.constant 0 : index
    %37 = vector.load %arg11[%c0_29, %c0_30] : memref<128x128xbf16, #tpu.memory_space<vmem>>, vector<128x128xbf16>
    %cst_31 = arith.constant dense<0.000000e+00> : vector<16x128xf32>
    %38 = tpu.matmul %36, %37, %cst_31 {dimension_numbers = #tpu.dot_dimension_numbers<[1], [0], [0], [1], [0, 0, 1, 1], [], []>} : vector<16x128xbf16>, vector<128x128xbf16>, vector<16x128xf32> -> vector<16x128xf32>
    %c0_32 = arith.constant 0 : index
    %c0_33 = arith.constant 0 : index
    %39 = vector.load %arg12[%c0_32, %c0_33] : memref<1x128xf32, #tpu.memory_space<vmem>>, vector<1x128xf32>
    %40 = vector.broadcast %39 : vector<1x128xf32> to vector<16x128xf32>
    %41 = arith.addf %38, %40 : vector<16x128xf32>
    %c0_34 = arith.constant 0 : index
    %c0_35 = arith.constant 0 : index
    %42 = vector.load %arg13[%c0_34, %c0_35] : memref<16x128xf32, #tpu.memory_space<vmem>>, vector<16x128xf32>
    tpu.vector_store %arg13[%c0_34, %c0_35], %41 {strides = array<i32>} : memref<16x128xf32, #tpu.memory_space<vmem>>, vector<16x128xf32>,
    return
  }
}

</mosaic_0001>

<bundles_post_ra>
// kernel: tpu_custom_call.1
= control target key start
LH: loop header
LB: loop body
LE: loop exit
PB: predicated region body
PF: predicated region fallthrough
CT: control target
= control target key end

     0   :  { %18 = vsyncpa [#allocation3], 0  ;;  %s1699_s0 = inlined_call_operand.hbm [shape: bf16[32,128], index: 0, kind: input, shape index: {}]   ;;  %s1700_s1 = inlined_call_operand.hbm [shape: bf16[128,128], index: 1, kind: input, shape index: {}]   ;;  %s1701_s2 = inlined_call_operand.vmem [shape: f32[1,128], index: 2, kind: input, shape index: {}]   ;;  %s1702_s3 = inlined_call_operand.hbm [shape: bf16[16,32], index: 3, kind: input, shape index: {}]   ;;  %s1703_s4 = inlined_call_operand.hbm [shape: bf16[128,128], index: 4, kind: input, shape index: {}]   ;;  %s1704_s5 = inlined_call_operand.vmem [shape: f32[1,128], index: 5, kind: input, shape index: {}]   ;;  %s1705_s6 = inlined_call_operand.hbm [shape: bf16[128,128], index: 6, kind: input, shape index: {}]   ;;  %s1706_s7 = inlined_call_operand.vmem [shape: bf16[16,16], index: 7, kind: input, shape index: {}]   ;;  %s1707_s8 = inlined_call_operand.hbm [shape: bf16[128,128], index: 8, kind: input, shape index: {}]   ;;  %s1708_s9 = inlined_call_operand.vmem [shape: f32[1,128], index: 9, kind: input, shape index: {}]   ;;  %s1709_s10 = inlined_call_operand.hbm [shape: bf16[128,128], index: 10, kind: input, shape index: {}]   ;;  %s1710_s11 = inlined_call_operand.hbm [shape: bf16[128,128], index: 11, kind: input, shape index: {}]   ;;  %s1711_s12 = inlined_call_operand.vmem [shape: f32[1,128], index: 12, kind: input, shape index: {}]   ;;  %s1712_s13 = inlined_call_operand.hbm [shape: f32[16,128], index: 13, kind: output, shape index: {}]  }
   0x1   :  { %19 = vsyncpa [#allocation6], 0 }
   0x2   :  { %20 = vsyncpa [#allocation9], 0 }
   0x3   :  { %21 = vsyncpa [#allocation12], 0 }
   0x4   :  { %22 = vsyncpa [#allocation15], 0 }
   0x5   :  { %23 = vsyncpa [#allocation4], 0  ;;  %s1491_s25 = smov [#allocation5]   ;;  %s1492_s27 = smov [#allocation8]  }
   0x6   :  { %s41_s26 = sshll.u32 %s1491_s25, 4  ;;  %s67_s28 = sshll.u32 %s1492_s27, 4  ;;  %s42_s26 = int_to_ptr.vmem [resolvable:$true] %s41_s26  ;;  %s68_s28 = int_to_ptr.vmem [resolvable:$true] %s67_s28 }
   0x7   :  { %s1307_s29 = scalar_lea.vmem %s42_s26, 1024  ;;  %p1312_p1 = scmp.lt.s32.totalorder %s42_s26, %s42_s26 }
   0x8   :  { %p1308_p0 = scmp.ne.s32.totalorder %s42_s26, %s1307_s29  ;;  %p1313_p2 = scmp.lt.s32.totalorder %s1307_s29, %s1307_s29 }
   0xa   :  { %p1314_p3 = por %p1313_p2, %p1312_p1 }
   0xc   :  { %p1315_p4 = pnand %p1314_p3, %p1308_p0 }
   0xe   :  { %1318 = shalt.err (!%p1315_p4)
}
   0xf   :  { %s1493_s30 = smov 64   ;;  %s1494_s14 = smov 4  }
  0x10   :  { %47 = dma.hbm_to_vmem [thread:$0]  %s1700_s1, 1024, %s42_s26, [#allocation6], %s1493_s30, %s1493_s30, %s1494_s14  }
  0x11   :  { %s1327_s17 = scalar_lea.vmem %s68_s28, 1024  ;;  %p1332_p6 = scmp.lt.s32.totalorder %s68_s28, %s68_s28 }
  0x12   :  { %p1328_p5 = scmp.ne.s32.totalorder %s68_s28, %s1327_s17  ;;  %p1333_p7 = scmp.lt.s32.totalorder %s1327_s17, %s1327_s17 }
  0x14   :  { %p1334_p8 = por %p1333_p7, %p1332_p6 }
  0x16   :  { %p1335_p9 = pnand %p1334_p8, %p1328_p5 }
  0x18   :  { %1338 = shalt.err (!%p1335_p9)
}
  0x19   :  { %73 = dma.hbm_to_vmem [thread:$0]  %s1703_s4, 1024, %s68_s28, [#allocation9], %s1493_s30, %s1493_s30, %s1494_s14  }
  0x1a   :  { %s1495_s20 = smov [#allocation11]   ;;  %s1496_s22 = smov [#allocation2]  }
  0x1b   :  { %s95_s21 = sshll.u32 %s1495_s20, 4  ;;  %s29_s23 = sshll.u32 %s1496_s22, 4  ;;  %s96_s21 = int_to_ptr.vmem [resolvable:$true] %s95_s21  ;;  %s30_s23 = int_to_ptr.vmem [resolvable:$true] %s29_s23 }
  0x1c   :  { %s1347_s1 = scalar_lea.vmem %s96_s21, 1024  ;;  %p1352_p11 = scmp.lt.s32.totalorder %s96_s21, %s96_s21 }
  0x1d   :  { %p1348_p10 = scmp.ne.s32.totalorder %s96_s21, %s1347_s1  ;;  %p1353_p12 = scmp.lt.s32.totalorder %s1347_s1, %s1347_s1 }
  0x1f   :  { %p1354_p13 = por %p1353_p12, %p1352_p11 }
  0x21   :  { %p1355_p0 = pnand %p1354_p13, %p1348_p10 }
  0x23   :  { %1358 = shalt.err (!%p1355_p0)
}
  0x24   :  { %101 = dma.hbm_to_vmem [thread:$0]  %s1707_s8, 1024, %s96_s21, [#allocation12], %s1493_s30, %s1493_s30, %s1494_s14  }
  0x25   :  { %s1367_s4 = scalar_lea.vmem %s30_s23, 256  ;;  %p1372_p2 = scmp.lt.s32.totalorder %s30_s23, %s30_s23 }
  0x26   :  { %p1368_p1 = scmp.ne.s32.totalorder %s30_s23, %s1367_s4  ;;  %p1373_p3 = scmp.lt.s32.totalorder %s1367_s4, %s1367_s4 }
  0x28   :  { %p1374_p4 = por %p1373_p3, %p1372_p2 }
  0x2a   :  { %p1375_p5 = pnand %p1374_p4, %p1368_p1 }
  0x2c   :  { %1378 = shalt.err (!%p1375_p5)
}
  0x2d   :  { %35 = dma.hbm_to_vmem [thread:$0]  %s1699_s0, 256, %s30_s23, [#allocation3], %s1493_s30, %s1493_s30, %s1494_s14  }
  0x2e   :  { %s1497_s28 = smov [#allocation7]   ;;  %s1498_s15 = smov [#allocation10]  }
  0x2f   :  { %s55_s29 = sshll.u32 %s1497_s28, 4  ;;  %s81_s16 = sshll.u32 %s1498_s15, 4  ;;  %s56_s29 = int_to_ptr.vmem [resolvable:$true] %s55_s29  ;;  %s82_s16 = int_to_ptr.vmem [resolvable:$true] %s81_s16 }
  0x30   :  { %s1387_s8 = scalar_lea.vmem %s56_s29, 128  ;;  %p1392_p7 = scmp.lt.s32.totalorder %s56_s29, %s56_s29 }
  0x31   :  { %p1388_p6 = scmp.ne.s32.totalorder %s56_s29, %s1387_s8  ;;  %p1393_p8 = scmp.lt.s32.totalorder %s1387_s8, %s1387_s8 }
  0x33   :  { %p1394_p9 = por %p1393_p8, %p1392_p7 }
  0x35   :  { %p1395_p10 = pnand %p1394_p9, %p1388_p6 }
  0x37   :  { %1398 = shalt.err (!%p1395_p10)
}
  0x38   :  { %61 = dma.hbm_to_vmem [thread:$0]  %s1702_s3, 128, %s56_s29, [#allocation6], %s1493_s30, %s1493_s30, %s1494_s14  }
  0x39   :  { %s1407_s0 = scalar_lea.vmem %s82_s16, 1024  ;;  %p1412_p12 = scmp.lt.s32.totalorder %s82_s16, %s82_s16 }
  0x3a   :  { %p1408_p11 = scmp.ne.s32.totalorder %s82_s16, %s1407_s0  ;;  %p1413_p13 = scmp.lt.s32.totalorder %s1407_s0, %s1407_s0 }
  0x3c   :  { %p1414_p0 = por %p1413_p13, %p1412_p12 }
  0x3e   :  { %p1415_p1 = pnand %p1414_p0, %p1408_p11 }
  0x40   :  { %1418 = shalt.err (!%p1415_p1)
}
  0x41   :  { %87 = dma.hbm_to_vmem [thread:$0]  %s1705_s6, 1024, %s82_s16, [#allocation9], %s1493_s30, %s1493_s30, %s1494_s14  }
  0x42   :  { %s1499_s21 = smov [#allocation13]   ;;  %s1500_s23 = smov [#allocation14]  }
  0x43   :  { %s109_s22 = sshll.u32 %s1499_s21, 4  ;;  %s121_s1 = sshll.u32 %s1500_s23, 4  ;;  %s110_s22 = int_to_ptr.vmem [resolvable:$true] %s109_s22  ;;  %s122_s1 = int_to_ptr.vmem [resolvable:$true] %s121_s1 }
  0x44   :  { %s1427_s3 = scalar_lea.vmem %s110_s22, 1024  ;;  %p1432_p3 = scmp.lt.s32.totalorder %s110_s22, %s110_s22 }
  0x45   :  { %p1428_p2 = scmp.ne.s32.totalorder %s110_s22, %s1427_s3  ;;  %p1433_p4 = scmp.lt.s32.totalorder %s1427_s3, %s1427_s3 }
  0x47   :  { %p1434_p5 = por %p1433_p4, %p1432_p3 }
  0x49   :  { %p1435_p6 = pnand %p1434_p5, %p1428_p2 }
  0x4b   :  { %1438 = shalt.err (!%p1435_p6)
}
  0x4c   :  { %115 = dma.hbm_to_vmem [thread:$0]  %s1709_s10, 1024, %s110_s22, [#allocation12], %s1493_s30, %s1493_s30, %s1494_s14  }
  0x4d   :  { %s1447_s6 = scalar_lea.vmem %s122_s1, 1024  ;;  %p1452_p8 = scmp.lt.s32.totalorder %s122_s1, %s122_s1 }
  0x4e   :  { %p1448_p7 = scmp.ne.s32.totalorder %s122_s1, %s1447_s6  ;;  %p1453_p9 = scmp.lt.s32.totalorder %s1447_s6, %s1447_s6 }
  0x50   :  { %p1454_p10 = por %p1453_p9, %p1452_p8 }
  0x52   :  { %p1455_p11 = pnand %p1454_p10, %p1448_p7 }
  0x54   :  { %1458 = shalt.err (!%p1455_p11)
}
  0x55   :  { %127 = dma.hbm_to_vmem [thread:$0]  %s1710_s11, 1024, %s122_s1, [#allocation15], %s1493_s30, %s1493_s30, %s1494_s14  }
  0x56   :  { %1479 = dma.done.wait [#allocation3], 256  }
  0x57   :  { %1480 = vsyncadd [#allocation3], 4294967040 }
  0x58   :  { %1481 = dma.done.wait [#allocation6], 1152  }
  0x59   :  { %1482 = vsyncadd [#allocation6], 4294966144 }
  0x5a   :  { %1483 = dma.done.wait [#allocation9], 2048  }
  0x5b   :  { %1484 = vsyncadd [#allocation9], 4294965248 }
  0x5c   :  { %1485 = dma.done.wait [#allocation12], 2048  }
  0x5d   :  { %1486 = vsyncadd [#allocation12], 4294965248 }
  0x5e   :  { %1487 = dma.done.wait [#allocation15], 1024  }
  0x5f   :  { %1488 = vsyncadd [#allocation15], 4294966272  ;;  %v1247_v0 = vld [vmem:[#allocation5 + $0x38] sm:$0xff]   ;;  %v1248_v1 = vld [vmem:[#allocation5 + $0x30] sm:$0xff]   ;;  %v1501_v10 = vmov 0.0   ;;  %vm1502_vm0 = vmmov 0  }
  0x60   :  { %1098 = vmatprep.subr.bf16.mxu0 %v1247_v0  ;;  %v1249_v2 = vld [vmem:[#allocation5 + $0x28] sm:$0xff]   ;;  %v1250_v3 = vld [vmem:[#allocation5 + $0x20] sm:$0xff]   ;;  %v1255_v4 = vld [vmem:[#allocation2] sm:$0xff]   ;;  %1126 = vmatprep.subr.bf16.mxu1 %v1501_v10  ;;  %vm300_vm1 = vcmask 261120   ;;  %vm579_vm4 = vcmask 130048   ;;  %s1503_s15 = smov [#allocation16]  }
  0x61   :  { %1099 = vmatpush3.bf16.msra.mxu0 %v1247_v0  ;;  %v1251_v5 = vld [vmem:[#allocation5 + $0x18] sm:$0xff]   ;;  %1114 = vmatprep.mubr.bf16.mxu0 %v1255_v4  ;;  %v1252_v6 = vld [vmem:[#allocation5 + $0x10] sm:$0xff]   ;;  %v1253_v7 = vld [vmem:[#allocation5 + $0x8] sm:$0xff]   ;;  %s964_s16 = sshll.u32 %s1503_s15, 4  ;;  %s965_s16 = int_to_ptr.vmem [resolvable:$true] %s964_s16 }
  0x62   :  { %1100 = vmatprep.subr.bf16.mxu0 %v1248_v1  ;;  %v1254_v8 = vld [vmem:[#allocation5] sm:$0xff]   ;;  %v1256_v9 = vld [vmem:[#allocation2 + $0x8] sm:$0xff]   ;;  %1142 = vmatprep.mubr.msk.bf16.mxu1 %vm1502_vm0, %v1501_v10  ;;  %v1268_v13 = vld [vmem:[#allocation8 + $0x28] sm:$0xff]   ;;  %p1464_p13 = scmp.lt.s32.totalorder %s965_s16, %s965_s16 }
  0x63   :  { %v1266_v11 = vld [vmem:[#allocation8 + $0x38] sm:$0xff]   ;;  %v1267_v12 = vld [vmem:[#allocation8 + $0x30] sm:$0xff]   ;;  %v1269_v14 = vld [vmem:[#allocation8 + $0x20] sm:$0xff]  }
  0x64   :  { %1127 = vmatpush3.bf16.msra.mxu1 %v1266_v11  ;;  %v1270_v15 = vld [vmem:[#allocation8 + $0x18] sm:$0xff]   ;;  %v1271_v16 = vld [vmem:[#allocation8 + $0x10] sm:$0xff]   ;;  %v980_v18 = vld [vmem:[%s1701_s2] ss:$0 sm:$0xff] }
  0x65   :  { %1101 = vmatpush3.bf16.msra.mxu0 %v1248_v1  ;;  %1128 = vmatprep.subr.bf16.mxu1 %v1501_v10  ;;  %v1257_v28 = vld [vmem:[#allocation7] sm:$0xff]   ;;  %v1259_v30 = vld [vmem:[#allocation10 + $0x30] sm:$0xff]   ;;  %v1260_v31 = vld [vmem:[#allocation10 + $0x28] sm:$0xff]  }
  0x66   :  { %1102 = vmatprep.subr.bf16.mxu0 %v1249_v2  ;;  %v1258_v29 = vld [vmem:[#allocation10 + $0x38] sm:$0xff]   ;;  %v1261_v32 = vld [vmem:[#allocation10 + $0x20] sm:$0xff]   ;;  %v1263_v34 = vld [vmem:[#allocation10 + $0x10] sm:$0xff]  }
  0x67   :  { %v1262_v33 = vld [vmem:[#allocation10 + $0x18] sm:$0xff]   ;;  %v1264_v35 = vld [vmem:[#allocation10 + $0x8] sm:$0xff]   ;;  %v1265_v36 = vld [vmem:[#allocation10] sm:$0xff]  }
  0x68   :  { %1129 = vmatpush3.bf16.msra.mxu1 %v1267_v12  ;;  %v1272_v37 = vld [vmem:[#allocation8 + $0x8] sm:$0xff]   ;;  %v1273_v38 = vld [vmem:[#allocation8] sm:$0xff]   ;;  %v1274_v39 = vld [vmem:[#allocation13 + $0x38] sm:$0xff]  }
  0x69   :  { %1103 = vmatpush3.bf16.msra.mxu0 %v1249_v2  ;;  %1130 = vmatprep.subr.bf16.mxu1 %v1501_v10  ;;  %v1275_v40 = vld [vmem:[#allocation13 + $0x30] sm:$0xff]   ;;  %v1276_v41 = vld [vmem:[#allocation13 + $0x28] sm:$0xff]   ;;  %v1277_v42 = vld [vmem:[#allocation13 + $0x20] sm:$0xff]  }
  0x6a   :  { %1104 = vmatprep.subr.bf16.mxu0 %v1250_v3  ;;  %v1278_v43 = vld [vmem:[#allocation13 + $0x18] sm:$0xff]   ;;  %v1279_v53 = vld [vmem:[#allocation13 + $0x10] sm:$0xff]   ;;  %v1280_v54 = vld [vmem:[#allocation13 + $0x8] sm:$0xff]  }
  0x6b   :  { %v1281_v55 = vld [vmem:[#allocation13] sm:$0xff]   ;;  %v993_v56 = vld [vmem:[%s1704_s5] ss:$0 sm:$0xff]  ;;  %v1287_v12 = vld [vmem:[#allocation11 + $0x18] sm:$0xff]  }
  0x6c   :  { %1131 = vmatpush3.bf16.msra.mxu1 %v1268_v13  ;;  %v1286_v11 = vld [vmem:[#allocation11 + $0x20] sm:$0xff]   ;;  %v1288_v13 = vld [vmem:[#allocation11 + $0x10] sm:$0xff]  }
  0x6d   :  { %1105 = vmatpush3.bf16.msra.mxu0 %v1250_v3  ;;  %1132 = vmatprep.subr.bf16.mxu1 %v1501_v10 }
  0x6e   :  { %1106 = vmatprep.subr.bf16.mxu0 %v1251_v5 }
  0x70   :  { %1133 = vmatpush3.bf16.msra.mxu1 %v1269_v14  ;;  %v1289_v14 = vld [vmem:[#allocation11 + $0x8] sm:$0xff]  }
  0x71   :  { %1107 = vmatpush3.bf16.msra.mxu0 %v1251_v5  ;;  %1134 = vmatprep.subr.bf16.mxu1 %v1501_v10 }
  0x72   :  { %1108 = vmatprep.subr.bf16.mxu0 %v1252_v6 }
  0x74   :  { %1135 = vmatpush3.bf16.msra.mxu1 %v1270_v15  ;;  %v1290_v15 = vld [vmem:[#allocation11] sm:$0xff]  }
  0x75   :  { %1109 = vmatpush3.bf16.msra.mxu0 %v1252_v6  ;;  %1136 = vmatprep.subr.bf16.mxu1 %v1501_v10  ;;  %v1282_v6 = vld [vmem:[%s1706_s7] sm:$0xff]  }
  0x76   :  { %1110 = vmatprep.subr.bf16.mxu0 %v1253_v7 }
  0x78   :  { %1137 = vmatpush3.bf16.msra.mxu1 %v1271_v16 }
  0x79   :  { %1111 = vmatpush3.bf16.msra.mxu0 %v1253_v7  ;;  %1138 = vmatprep.subr.bf16.mxu1 %v1501_v10  ;;  %v1283_v7 = vld [vmem:[#allocation11 + $0x38] sm:$0xff]  }
  0x7a   :  { %1112 = vmatprep.subr.bf16.mxu0 %v1254_v8 }
  0x7c   :  { %1139 = vmatpush3.bf16.msra.mxu1 %v1272_v37 }
  0x7d   :  { %1113 = vmatpush3.bf16.msra.mxu0 %v1254_v8  ;;  %1140 = vmatprep.subr.bf16.mxu1 %v1501_v10  ;;  %v1284_v8 = vld [vmem:[#allocation11 + $0x30] sm:$0xff]  }
  0x7e   :  { %1118 = vmatprep.subr.bf16.mxu0 %v1501_v10 }
  0x80   :  { %1115 = vmatmul.mubr.bf16.vlgmr.msra.gmra.mxu0 %v1256_v9  ;;  %1141 = vmatpush3.bf16.msra.mxu1 %v1273_v38  ;;  %v1285_v9 = vld [vmem:[#allocation11 + $0x28] sm:$0xff]  }
  0x81   :  { %1122 = vmatprep.mubr.msk.bf16.mxu0 %vm1502_vm0, %v1501_v10  ;;  %1166 = vmatprep.subr.bf16.mxu1 %v1501_v10 }
 0x140   :  { %v1116_v17 = vpop.f32.mrf.mxu0 }
 0x141   :  { %v285_v21 = vadd.f32 %v1116_v17, %v980_v18 }
 0x142   :  { %v276_v19 = vpop.f32.mrf.mxu0 }
 0x143   :  { %v277_v26 = vadd.f32 %v980_v18, %v276_v19 }
 0x144   :  { %v1117_v20 = vpop.f32.mrf.mxu0 }
 0x145   :  { %v288_v22 = vadd.f32 %v1117_v20, %v980_v18 }
 0x146   :  { %v279_v23 = vpop.f32.mrf.mxu0 }
 0x147   :  { %v292_v24 = vpack.c.bf16 %v288_v22, %v285_v21  ;;  %v280_v25 = vadd.f32 %v980_v18, %v279_v23  ;;  %v1291_v23 = vld [vmem:[#allocation14 + $0x38] sm:$0xff]  }
 0x149   :  { %1119 = vmatpush3.bf16.msra.mxu0 %v292_v24  ;;  %v291_v27 = vpack.c.bf16 %v280_v25, %v277_v26  ;;  %v1292_v26 = vld [vmem:[#allocation14 + $0x30] sm:$0xff]  }
 0x14a   :  { %1120 = vmatprep.subr.bf16.mxu0 %v1501_v10 }
 0x14d   :  { %1121 = vmatpush3.bf16.msra.mxu0 %v291_v27 }
 0x14e   :  { %1146 = vmatprep.subr.bf16.mxu0 %v1501_v10 }
 0x150   :  { %1123 = vmatmul.mubr.msk.bf16.vlgmr.msra.gmra.mxu0 %vm300_vm1, %v1257_v28  ;;  %v1294_v28 = vld [vmem:[#allocation14 + $0x20] sm:$0xff]  }
 0x151   :  { %1147 = vmatpush3.bf16.msra.mxu0 %v1258_v29  ;;  %1162 = vmatprep.mubr.msk.bf16.mxu0 %vm1502_vm0, %v1501_v10  ;;  %v1295_v29 = vld [vmem:[#allocation14 + $0x18] sm:$0xff]  }
 0x152   :  { %1148 = vmatprep.subr.bf16.mxu0 %v1501_v10 }
 0x155   :  { %1149 = vmatpush3.bf16.msra.mxu0 %v1259_v30  ;;  %v1296_v30 = vld [vmem:[#allocation14 + $0x10] sm:$0xff]  }
 0x156   :  { %1150 = vmatprep.subr.bf16.mxu0 %v1501_v10 }
 0x159   :  { %1151 = vmatpush3.bf16.msra.mxu0 %v1260_v31  ;;  %v1297_v31 = vld [vmem:[#allocation14 + $0x8] sm:$0xff]  }
 0x15a   :  { %1152 = vmatprep.subr.bf16.mxu0 %v1501_v10 }
 0x15d   :  { %1153 = vmatpush3.bf16.msra.mxu0 %v1261_v32  ;;  %v1298_v32 = vld [vmem:[#allocation14] sm:$0xff]  }
 0x15e   :  { %1154 = vmatprep.subr.bf16.mxu0 %v1501_v10 }
 0x161   :  { %1155 = vmatpush3.bf16.msra.mxu0 %v1262_v33  ;;  %v1012_v33 = vld [vmem:[%s1708_s9] ss:$0 sm:$0xff]  ;;  %s1459_s9 = scalar_lea.vmem %s965_s16, 256 }
 0x162   :  { %1156 = vmatprep.subr.bf16.mxu0 %v1501_v10  ;;  %p1460_p12 = scmp.ne.s32.totalorder %s965_s16, %s1459_s9  ;;  %p1465_p0 = scmp.lt.s32.totalorder %s1459_s9, %s1459_s9 }
 0x164   :  { %p1466_p1 = por %p1465_p0, %p1464_p13 }
 0x165   :  { %1157 = vmatpush3.bf16.msra.mxu0 %v1263_v34 }
 0x166   :  { %1158 = vmatprep.subr.bf16.mxu0 %v1501_v10  ;;  %p1467_p2 = pnand %p1466_p1, %p1460_p12 }
 0x169   :  { %1159 = vmatpush3.bf16.msra.mxu0 %v1264_v35 }
 0x16a   :  { %1160 = vmatprep.subr.bf16.mxu0 %v1501_v10 }
 0x16d   :  { %1161 = vmatpush3.bf16.msra.mxu0 %v1265_v36 }
 0x16e   :  { %1192 = vmatprep.subr.bf16.mxu0 %v1501_v10 }
 0x170   :  { %1163 = vmatmul.mubr.bf16.vlgmr.msra.gmra.mxu0 %v291_v27  ;;  %v1293_v27 = vld [vmem:[#allocation14 + $0x28] sm:$0xff]  }
 0x171   :  { %1208 = vmatprep.mubr.msk.bf16.mxu0 %vm1502_vm0, %v1501_v10  ;;  %1193 = vmatpush3.bf16.msra.mxu0 %v1274_v39 }
 0x172   :  { %1194 = vmatprep.subr.bf16.mxu0 %v1501_v10 }
 0x175   :  { %1195 = vmatpush3.bf16.msra.mxu0 %v1275_v40 }
 0x176   :  { %1196 = vmatprep.subr.bf16.mxu0 %v1501_v10 }
 0x179   :  { %1197 = vmatpush3.bf16.msra.mxu0 %v1276_v41 }
 0x17a   :  { %1198 = vmatprep.subr.bf16.mxu0 %v1501_v10 }
 0x17d   :  { %1199 = vmatpush3.bf16.msra.mxu0 %v1277_v42 }
 0x17e   :  { %1200 = vmatprep.subr.bf16.mxu0 %v1501_v10 }
 0x181   :  { %1201 = vmatpush3.bf16.msra.mxu0 %v1278_v43 }
 0x182   :  { %1202 = vmatprep.subr.bf16.mxu0 %v1501_v10 }
 0x185   :  { %1203 = vmatpush3.bf16.msra.mxu0 %v1279_v53 }
 0x186   :  { %1204 = vmatprep.subr.bf16.mxu0 %v1501_v10 }
 0x189   :  { %1205 = vmatpush3.bf16.msra.mxu0 %v1280_v54 }
 0x18a   :  { %1206 = vmatprep.subr.bf16.mxu0 %v1501_v10 }
 0x18d   :  { %1207 = vmatpush3.bf16.msra.mxu0 %v1281_v55 }
 0x210   :  { %v338_v44 = vpop.f32.mrf.mxu0 }
 0x212   :  { %v1124_v45 = vpop.f32.mrf.mxu0 }
 0x214   :  { %v341_v46 = vpop.f32.mrf.mxu0 }
 0x215   :  { %v345_v47 = vpack.c.bf16 %v341_v46, %v338_v44 }
 0x216   :  { %v1125_v48 = vpop.f32.mrf.mxu0 }
 0x217   :  { %1143 = vmatmul.mubr.bf16.vlgmr.msra.gmra.mxu1 %v345_v47 }
 0x218   :  { %1168 = vmatprep.mubr.msk.bf16.mxu1 %vm1502_vm0, %v1501_v10 }
 0x230   :  { %v556_v49 = vpop.f32.mrf.mxu0 }
 0x232   :  { %v1164_v50 = vpop.f32.mrf.mxu0 }
 0x234   :  { %v559_v51 = vpop.f32.mrf.mxu0 }
 0x236   :  { %v1165_v52 = vpop.f32.mrf.mxu0 }
 0x2d7   :  { %v451_v57 = vpop.f32.mrf.mxu1 }
 0x2d8   :  { %v452_v58 = vadd.f32 %v993_v56, %v451_v57 }
 0x2d9   :  { %v1144_v59 = vpop.f32.mrf.mxu1 }
 0x2da   :  { %v563_v60 = vadd.f32 %v556_v49, %v452_v58 }
 0x2db   :  { %v454_v61 = vpop.f32.mrf.mxu1 }
 0x2dc   :  { %v455_v62 = vadd.f32 %v993_v56, %v454_v61  ;;  %v567_v0 = vmul.f32 0.01, %v563_v60  ;;  %vm565_vm2 = vcmp.gt.f32.partialorder %v563_v60, 0.0 }
 0x2dd   :  { %v1145_v63 = vpop.f32.mrf.mxu1 }
 0x2de   :  { %v564_v1 = vadd.f32 %v559_v51, %v455_v62  ;;  %v569_v3 = vsel %vm565_vm2, %v563_v60, %v567_v0 }
 0x2e0   :  { %vm566_vm3 = vcmp.gt.f32.partialorder %v564_v1, 0.0  ;;  %v568_v2 = vmul.f32 0.01, %v564_v1 }
 0x2e2   :  { %v570_v4 = vsel %vm566_vm3, %v564_v1, %v568_v2 }
 0x2e3   :  { %v571_v5 = vpack.c.bf16 %v570_v4, %v569_v3 }
 0x2e5   :  { %1167 = vmatpush3.bf16.msra.mxu1 %v571_v5  ;;  %1209 = vmatmul.mubr.bf16.vlgmr.msra.gmra.mxu0 %v571_v5 }
 0x2e6   :  { %1172 = vmatprep.subr.bf16.mxu1 %v1501_v10 }
 0x2e8   :  { %1169 = vmatmul.mubr.msk.bf16.vlgmr.msra.gmra.mxu1 %vm579_vm4, %v1282_v6 }
 0x2e9   :  { %1173 = vmatpush3.bf16.msra.mxu1 %v1283_v7  ;;  %1188 = vmatprep.mubr.msk.bf16.mxu1 %vm1502_vm0, %v1501_v10 }
 0x2ea   :  { %1174 = vmatprep.subr.bf16.mxu1 %v1501_v10 }
 0x2ed   :  { %1175 = vmatpush3.bf16.msra.mxu1 %v1284_v8 }
 0x2ee   :  { %1176 = vmatprep.subr.bf16.mxu1 %v1501_v10 }
 0x2f1   :  { %1177 = vmatpush3.bf16.msra.mxu1 %v1285_v9 }
 0x2f2   :  { %1178 = vmatprep.subr.bf16.mxu1 %v1501_v10 }
 0x2f5   :  { %1179 = vmatpush3.bf16.msra.mxu1 %v1286_v11 }
 0x2f6   :  { %1180 = vmatprep.subr.bf16.mxu1 %v1501_v10 }
 0x2f9   :  { %1181 = vmatpush3.bf16.msra.mxu1 %v1287_v12 }
 0x2fa   :  { %1182 = vmatprep.subr.bf16.mxu1 %v1501_v10 }
 0x2fd   :  { %1183 = vmatpush3.bf16.msra.mxu1 %v1288_v13 }
 0x2fe   :  { %1184 = vmatprep.subr.bf16.mxu1 %v1501_v10 }
 0x301   :  { %1185 = vmatpush3.bf16.msra.mxu1 %v1289_v14 }
 0x302   :  { %1186 = vmatprep.subr.bf16.mxu1 %v1501_v10 }
 0x305   :  { %1187 = vmatpush3.bf16.msra.mxu1 %v1290_v15 }
 0x306   :  { %1212 = vmatprep.subr.bf16.mxu1 %v1501_v10 }
 0x3a5   :  { %v835_v16 = vpop.f32.mrf.mxu0 }
 0x3a7   :  { %v1210_v17 = vpop.f32.mrf.mxu0 }
 0x3a8   :  { %v617_v18 = vpop.f32.mrf.mxu1 }
 0x3a9   :  { %v838_v19 = vpop.f32.mrf.mxu0 }
 0x3aa   :  { %v1170_v20 = vpop.f32.mrf.mxu1 }
 0x3ab   :  { %v1211_v21 = vpop.f32.mrf.mxu0 }
 0x3ac   :  { %v620_v22 = vpop.f32.mrf.mxu1 }
 0x3ad   :  { %v624_v24 = vpack.c.bf16 %v620_v22, %v617_v18 }
 0x3ae   :  { %v1171_v25 = vpop.f32.mrf.mxu1 }
 0x3af   :  { %1189 = vmatmul.mubr.bf16.vlgmr.msra.gmra.mxu1 %v624_v24 }
 0x3b0   :  { %1213 = vmatpush3.bf16.msra.mxu1 %v1291_v23  ;;  %1228 = vmatprep.mubr.msk.bf16.mxu1 %vm1502_vm0, %v1501_v10 }
 0x3b1   :  { %1214 = vmatprep.subr.bf16.mxu1 %v1501_v10 }
 0x3b4   :  { %1215 = vmatpush3.bf16.msra.mxu1 %v1292_v26 }
 0x3b5   :  { %1216 = vmatprep.subr.bf16.mxu1 %v1501_v10 }
 0x3b8   :  { %1217 = vmatpush3.bf16.msra.mxu1 %v1293_v27 }
 0x3b9   :  { %1218 = vmatprep.subr.bf16.mxu1 %v1501_v10 }
 0x3bc   :  { %1219 = vmatpush3.bf16.msra.mxu1 %v1294_v28 }
 0x3bd   :  { %1220 = vmatprep.subr.bf16.mxu1 %v1501_v10 }
 0x3c0   :  { %1221 = vmatpush3.bf16.msra.mxu1 %v1295_v29 }
 0x3c1   :  { %1222 = vmatprep.subr.bf16.mxu1 %v1501_v10 }
 0x3c4   :  { %1223 = vmatpush3.bf16.msra.mxu1 %v1296_v30 }
 0x3c5   :  { %1224 = vmatprep.subr.bf16.mxu1 %v1501_v10 }
 0x3c8   :  { %1225 = vmatpush3.bf16.msra.mxu1 %v1297_v31 }
 0x3c9   :  { %1226 = vmatprep.subr.bf16.mxu1 %v1501_v10  ;;  %v1029_v10 = vld [vmem:[%s1711_s12] ss:$0 sm:$0xff] }
 0x3cc   :  { %1227 = vmatpush3.bf16.msra.mxu1 %v1298_v32 }
 0x46f   :  { %v730_v34 = vpop.f32.mrf.mxu1 }
 0x470   :  { %v731_v36 = vadd.f32 %v1012_v33, %v730_v34 }
 0x471   :  { %v1190_v35 = vpop.f32.mrf.mxu1 }
 0x472   :  { %v842_v40 = vadd.f32 %v835_v16, %v731_v36 }
 0x473   :  { %v733_v37 = vpop.f32.mrf.mxu1 }
 0x474   :  { %v734_v38 = vadd.f32 %v1012_v33, %v733_v37 }
 0x475   :  { %v1191_v39 = vpop.f32.mrf.mxu1 }
 0x476   :  { %v843_v41 = vadd.f32 %v838_v19, %v734_v38 }
 0x478   :  { %v844_v42 = vpack.c.bf16 %v843_v41, %v842_v40 }
 0x47a   :  { %1229 = vmatmul.mubr.bf16.vlgmr.msra.gmra.mxu1 %v844_v42 }
 0x53a   :  { %v950_v43 = vpop.f32.mrf.mxu1 }
 0x53b   :  { %v951_v44 = vadd.f32 %v1029_v10, %v950_v43 }
 0x53c   :  { %v1230_v45 = vpop.f32.mrf.mxu1 }
 0x53d   :  { %957 = vst [vmem:[#allocation16] sm:$0xff] %v951_v44 }
 0x53e   :  { %v953_v46 = vpop.f32.mrf.mxu1 }
 0x53f   :  { %v954_v47 = vadd.f32 %v1029_v10, %v953_v46 }
 0x540   :  { %v1231_v48 = vpop.f32.mrf.mxu1 }
 0x541   :  { %958 = vst [vmem:[#allocation16 + $0x8] sm:$0xff] %v954_v47 }
 0x542   :  { %1470 = shalt.err (!%p1467_p2)
}
 0x543   :  { %s1504_s8 = smov 128   ;;  %s1505_s12 = smov 8  }
 0x544   :  { %970 = dma.vmem_to_hbm [thread:$0]  %s965_s16, 256, %s1712_s13, [#allocation4], %s1504_s8, %s1504_s8, %s1505_s12  }
 0x545   :  { %1489 = dma.done.wait [#allocation4], 256  }
 0x546   :  { %1490 = vsyncadd [#allocation4], 4294967040 }
 0x547   :  { %974 = vsyncpa [#allocation3], 1 }
 0x548   :  { %975 = vsyncpa [#allocation6], 1 }
 0x549   :  { %976 = vsyncpa [#allocation9], 1 }
 0x54a   :  { %977 = vsyncpa [#allocation12], 1 }
 0x54b   :  { %978 = vsyncpa [#allocation15], 1 }
 0x54c   :  { %979 = vsyncpa [#allocation4], 1 }

</bundles_post_ra>
